<compile_context>
chip_gen: v6e
topology: v6e:2x2x1
jax: 0.10.0
libtpu: 0.0.40
codegen_flags: <defaults>
</compile_context>

<pallas_src>
import functools

import jax
import jax.numpy as jnp
from jax.experimental import pallas as pl
from jax.experimental.pallas import tpu as pltpu


def _grad3d_kernel(x_ref, out_ref, *, tb, w, hw, counts, penalty, num_rows):
    """x_ref: (tb, D*H*W) block of flattened volumes. out_ref: (8, 1) partial sums."""
    dhw = x_ref.shape[1]
    ragged = (num_rows % tb) != 0  # compile-time: does the last block overrun B?

    # Per-direction (shift, per-lane weight), built once per block at full
    # (8, dhw) so no broadcast is re-materialized inside the group loop.
    # With r = pltpu.roll(x, shift) (jnp.roll semantics: r[i] = x[i - shift]),
    # |x - r| at lane i is the forward difference of the pair (i - shift, i).
    # The weight keeps exactly the pairs that do not cross a W/H/D boundary
    # (this also masks the roll wrap-around lanes) and folds in the 1/count
    # mean normalizer.
    idx = jax.lax.broadcasted_iota(jnp.int32, (8, dhw), 1)
    n_dz, n_dx, n_dy = counts
    dirs = []
    if n_dz > 0:  # width (last-dim) difference
        dirs.append((1, jnp.where(idx % w != 0, 1.0 / n_dz, 0.0)))
    if n_dx > 0:  # height difference
        dirs.append((w, jnp.where(idx % hw >= w, 1.0 / n_dx, 0.0)))
    if n_dy > 0:  # depth difference
        dirs.append((hw, jnp.where(idx >= hw, 1.0 / n_dy, 0.0)))

    if not dirs:  # degenerate D == H == W == 1: no gradients (torch would NaN)
        out_ref[...] = jnp.zeros(out_ref.shape, out_ref.dtype)
        return

    base_row = pl.program_id(0) * tb

    def body(g, acc):
        start = pl.multiple_of(g * 8, 8)
        xg = x_ref[pl.ds(start, 8), :].astype(jnp.float32)
        pg = None
        for shift, weight in dirs:
            diff = xg - pltpu.roll(xg, shift=shift, axis=1)
            d = diff * diff if penalty == "l2" else jnp.abs(diff)
            term = d * weight
            pg = term if pg is None else pg + term
        if ragged:
            # Drop contributions from out-of-bounds (garbage / possibly NaN)
            # rows of the last block via select (not multiply, NaN-safe).
            rows = base_row + g * 8 + jax.lax.broadcasted_iota(jnp.int32, (8, 1), 0)
            pg = jnp.where(rows < num_rows, pg, 0.0)
        return acc + pg

    acc = jax.lax.fori_loop(0, tb // 8, body, jnp.zeros((8, dhw), jnp.float32))
    # Lane reduction once per block -> tiny (8, 1) writeback instead of a
    # DHW-wide slab (XLU reduce; off the VPU critical path).
    out_ref[...] = jnp.sum(acc, axis=1, keepdims=True)


def grad3d(y_pred, y_true=None, *, penalty="l1", loss_mult=None):
    """Pallas implementation of Grad3d.forward (y_true is unused, as in torch)."""
    N, C, D, H, W = y_pred.shape
    B = N * C
    HW = H * W
    DHW = D * HW
    x = y_pred.reshape(B, DHW)  # lane-dense flattening; free (row-major)

    # Element counts of the torch dy/dx/dz diff tensors (mean normalizers).
    # If D, H or W == 1 the corresponding diff is empty: we skip it (it
    # contributes 0) instead of the NaN the torch reference would produce.
    n_dy = B * (D - 1) * H * W
    n_dx = B * D * (H - 1) * W
    n_dz = B * D * H * (W - 1)

    # Pick TB (volumes per grid step): a multiple of 8 targeting ~4 MiB blocks
    # so per-step pipeline overhead (~0.35 us) is well amortized.  No input
    # padding/copy is done: a ragged last block is masked inside the kernel.
    itemsize = jnp.dtype(x.dtype).itemsize
    row_group_bytes = 8 * DHW * itemsize
    target_bytes = 4 * 1024 * 1024
    groups = max(1, target_bytes // row_group_bytes)
    b_ceil8 = -(-B // 8) * 8
    tb = int(min(8 * groups, b_ceil8))
    grid_n = -(-B // tb)

    # TODO(synk): volumes too large for VMEM (a single 8-row group beyond a few
    # MiB) would need a D-tiled grid with boundary-overlap reads; not needed here.
    in_block_bytes = tb * DHW * itemsize
    work_bytes = 8 * DHW * 4 * 6  # acc + xg + roll temp + 3 hoisted weights
    vmem_limit = int(min(max(2 * in_block_bytes + work_bytes + (2 << 20), 16 << 20),
                         40 << 20))

    kernel = functools.partial(
        _grad3d_kernel, tb=tb, w=W, hw=HW, counts=(n_dz, n_dx, n_dy),
        penalty=penalty, num_rows=B)

    partials = pl.pallas_call(
        kernel,
        out_shape=jax.ShapeDtypeStruct((grid_n * 8, 1), jnp.float32),
        grid=(grid_n,),
        in_specs=[pl.BlockSpec((tb, DHW), lambda b: (b, 0))],
        out_specs=pl.BlockSpec((8, 1), lambda b: (b, 0)),
        compiler_params=pltpu.CompilerParams(
            dimension_semantics=("parallel",),
            vmem_limit_bytes=vmem_limit,
        ),
    )(x)

    grad = jnp.sum(partials) / 3.0
    if loss_mult is not None:
        grad = grad * loss_mult
    return grad.astype(y_pred.dtype)


def _grad3d_ref(y_pred, penalty="l1", loss_mult=None):
    x = y_pred.astype(jnp.float32)
    dy = jnp.abs(x[:, :, 1:, :, :] - x[:, :, :-1, :, :])
    dx = jnp.abs(x[:, :, :, 1:, :] - x[:, :, :, :-1, :])
    dz = jnp.abs(x[:, :, :, :, 1:] - x[:, :, :, :, :-1])
    if penalty == "l2":
        dy, dx, dz = dy * dy, dx * dx, dz * dz
    d = jnp.mean(dx) + jnp.mean(dy) + jnp.mean(dz)
    grad = d / 3.0
    if loss_mult is not None:
        grad = grad * loss_mult
    return grad


if __name__ == "__main__":
    key = jax.random.PRNGKey(0)
    k1, k2 = jax.random.split(key)
    # Small NCDHW shapes: batch=2, channels=4, D=8, H=16, W=16
    y_pred = jax.random.normal(k1, (2, 4, 8, 16, 16), dtype=jnp.float32)
    y_true = jax.random.normal(k2, (2, 4, 8, 16, 16), dtype=jnp.float32)

    out_l1 = jax.block_until_ready(grad3d(y_pred, y_true, penalty="l1"))
    out_l2 = jax.block_until_ready(grad3d(y_pred, y_true, penalty="l2", loss_mult=2.0))

    ref_l1 = _grad3d_ref(y_pred, penalty="l1")
    ref_l2 = _grad3d_ref(y_pred, penalty="l2", loss_mult=2.0)

    assert jnp.allclose(out_l1, ref_l1, rtol=1e-5, atol=1e-5), (out_l1, ref_l1)
    assert jnp.allclose(out_l2, ref_l2, rtol=1e-5, atol=1e-5), (out_l2, ref_l2)

    print("KERNEL_OK")
</pallas_src>

<mosaic_0001>
module attributes {stable_mosaic.version = 11 : i64} {
  func.func @_grad3d_kernel(%arg0: i32, %arg1: memref<8x2048xf32, #tpu.memory_space<vmem>>, %arg2: memref<8x1xf32, #tpu.memory_space<vmem>>) attributes {dimension_semantics = [#tpu.dimension_semantics<parallel>], iteration_bounds = array<i64: 1>, scalar_prefetch = 0 : i64, scratch_operands = 0 : i64, tpu.core_type = #tpu.core_type<tc>, window_params = [{transform_indices = @transform_0, window_bounds = array<i64: 8, 2048>}, {transform_indices = @transform_1, window_bounds = array<i64: 8, 1>}]} {
    %0 = tpu.iota {dimensions = array<i32: 1>} : vector<8x2048xi32>
    %c16_i32 = arith.constant 16 : i32
    %c0_i32 = arith.constant 0 : i32
    %1 = arith.cmpi eq, %c16_i32, %c0_i32 : i32
    %c1_i32 = arith.constant 1 : i32
    %2 = arith.select %1, %c1_i32, %c16_i32 : i32
    %3 = vector.broadcast %2 : i32 to vector<8x2048xi32>
    %4 = arith.remsi %0, %3 : vector<8x2048xi32>
    %c0_i32_0 = arith.constant 0 : i32
    %5 = vector.broadcast %c0_i32_0 : i32 to vector<8x2048xi32>
    %6 = arith.cmpi ne, %4, %5 : vector<8x2048xi32>
    %c0_i32_1 = arith.constant 0 : i32
    %7 = vector.broadcast %c0_i32_1 : i32 to vector<8x2048xi32>
    %8 = arith.cmpi slt, %4, %7 : vector<8x2048xi32>
    %c0_i32_2 = arith.constant 0 : i32
    %9 = arith.cmpi slt, %2, %c0_i32_2 : i32
    %10 = vector.broadcast %9 : i1 to vector<8x2048xi1>
    %11 = vector.broadcast %10 : vector<8x2048xi1> to vector<8x2048xi1>
    %12 = arith.xori %8, %11 : vector<8x2048xi1>
    %13 = arith.andi %12, %6 : vector<8x2048xi1>
    %14 = vector.broadcast %2 : i32 to vector<8x2048xi32>
    %15 = arith.addi %4, %14 : vector<8x2048xi32>
    %16 = arith.select %13, %15, %4 : vector<8x2048xi1>, vector<8x2048xi32>
    %c0_i32_3 = arith.constant 0 : i32
    %17 = vector.broadcast %c0_i32_3 : i32 to vector<8x2048xi32>
    %18 = arith.cmpi ne, %16, %17 : vector<8x2048xi32>
    %cst = arith.constant 6.510417E-5 : f32
    %cst_4 = arith.constant 0.000000e+00 : f32
    %19 = vector.broadcast %cst : f32 to vector<8x2048xf32>
    %20 = vector.broadcast %cst_4 : f32 to vector<8x2048xf32>
    %21 = arith.select %18, %19, %20 : vector<8x2048xi1>, vector<8x2048xf32>
    %c256_i32 = arith.constant 256 : i32
    %c0_i32_5 = arith.constant 0 : i32
    %22 = arith.cmpi eq, %c256_i32, %c0_i32_5 : i32
    %c1_i32_6 = arith.constant 1 : i32
    %23 = arith.select %22, %c1_i32_6, %c256_i32 : i32
    %24 = vector.broadcast %23 : i32 to vector<8x2048xi32>
    %25 = arith.remsi %0, %24 : vector<8x2048xi32>
    %c0_i32_7 = arith.constant 0 : i32
    %26 = vector.broadcast %c0_i32_7 : i32 to vector<8x2048xi32>
    %27 = arith.cmpi ne, %25, %26 : vector<8x2048xi32>
    %c0_i32_8 = arith.constant 0 : i32
    %28 = vector.broadcast %c0_i32_8 : i32 to vector<8x2048xi32>
    %29 = arith.cmpi slt, %25, %28 : vector<8x2048xi32>
    %c0_i32_9 = arith.constant 0 : i32
    %30 = arith.cmpi slt, %23, %c0_i32_9 : i32
    %31 = vector.broadcast %30 : i1 to vector<8x2048xi1>
    %32 = vector.broadcast %31 : vector<8x2048xi1> to vector<8x2048xi1>
    %33 = arith.xori %29, %32 : vector<8x2048xi1>
    %34 = arith.andi %33, %27 : vector<8x2048xi1>
    %35 = vector.broadcast %23 : i32 to vector<8x2048xi32>
    %36 = arith.addi %25, %35 : vector<8x2048xi32>
    %37 = arith.select %34, %36, %25 : vector<8x2048xi1>, vector<8x2048xi32>
    %c16_i32_10 = arith.constant 16 : i32
    %38 = vector.broadcast %c16_i32_10 : i32 to vector<8x2048xi32>
    %39 = arith.cmpi sge, %37, %38 : vector<8x2048xi32>
    %cst_11 = arith.constant 6.510417E-5 : f32
    %cst_12 = arith.constant 0.000000e+00 : f32
    %40 = vector.broadcast %cst_11 : f32 to vector<8x2048xf32>
    %41 = vector.broadcast %cst_12 : f32 to vector<8x2048xf32>
    %42 = arith.select %39, %40, %41 : vector<8x2048xi1>, vector<8x2048xf32>
    %c256_i32_13 = arith.constant 256 : i32
    %43 = vector.broadcast %c256_i32_13 : i32 to vector<8x2048xi32>
    %44 = arith.cmpi sge, %0, %43 : vector<8x2048xi32>
    %cst_14 = arith.constant 6.97544674E-5 : f32
    %cst_15 = arith.constant 0.000000e+00 : f32
    %45 = vector.broadcast %cst_14 : f32 to vector<8x2048xf32>
    %46 = vector.broadcast %cst_15 : f32 to vector<8x2048xf32>
    %47 = arith.select %44, %45, %46 : vector<8x2048xi1>, vector<8x2048xf32>
    %cst_16 = arith.constant 0.000000e+00 : f32
    %48 = vector.broadcast %cst_16 : f32 to vector<8x2048xf32>
    %c0_i32_17 = arith.constant 0 : i32
    %c8_i32 = arith.constant 8 : i32
    %49 = arith.muli %c0_i32_17, %c8_i32 : i32
    %50 = tpu.assume_multiple %49, 8 : i32
    %51 = arith.index_cast %50 : i32 to index
    %c0 = arith.constant 0 : index
    %52 = vector.load %arg1[%51, %c0] : memref<8x2048xf32, #tpu.memory_space<vmem>>, vector<8x2048xf32>
    %c1_i32_18 = arith.constant 1 : i32
    %53 = tpu.dynamic_rotate %52 by %c1_i32_18 dim 1 : vector<8x2048xf32>, i32 -> vector<8x2048xf32>
    %54 = arith.subf %52, %53 : vector<8x2048xf32>
    %55 = math.absf %54 : vector<8x2048xf32>
    %56 = arith.mulf %55, %21 : vector<8x2048xf32>
    %c16_i32_19 = arith.constant 16 : i32
    %57 = tpu.dynamic_rotate %52 by %c16_i32_19 dim 1 : vector<8x2048xf32>, i32 -> vector<8x2048xf32>
    %58 = arith.subf %52, %57 : vector<8x2048xf32>
    %59 = math.absf %58 : vector<8x2048xf32>
    %60 = arith.mulf %59, %42 : vector<8x2048xf32>
    %61 = arith.addf %56, %60 : vector<8x2048xf32>
    %c256_i32_20 = arith.constant 256 : i32
    %62 = tpu.dynamic_rotate %52 by %c256_i32_20 dim 1 : vector<8x2048xf32>, i32 -> vector<8x2048xf32>
    %63 = arith.subf %52, %62 : vector<8x2048xf32>
    %64 = math.absf %63 : vector<8x2048xf32>
    %65 = arith.mulf %64, %47 : vector<8x2048xf32>
    %66 = arith.addf %61, %65 : vector<8x2048xf32>
    %67 = arith.addf %48, %66 : vector<8x2048xf32>
    %c1_i32_21 = arith.constant 1 : i32
    %cst_22 = arith.constant dense<0.000000e+00> : vector<8xf32>
    %68 = vector.multi_reduction <add>, %67, %cst_22 [1] : vector<8x2048xf32> to vector<8xf32>
    %69 = vector.shape_cast %68 : vector<8xf32> to vector<8x1xf32>
    %c0_23 = arith.constant 0 : index
    %c0_24 = arith.constant 0 : index
    %70 = vector.load %arg2[%c0_23, %c0_24] : memref<8x1xf32, #tpu.memory_space<vmem>>, vector<8x1xf32>
    tpu.vector_store %arg2[%c0_23, %c0_24], %69 {strides = array<i32>} : memref<8x1xf32, #tpu.memory_space<vmem>>, vector<8x1xf32>,
    return
  }
  func.func @transform_0(%arg0: i32) -> (i32, i32) {
    %c0_i32 = arith.constant 0 : i32
    %c0_i32_0 = arith.constant 0 : i32
    return %arg0, %c0_i32 : i32, i32
  }
  func.func @transform_1(%arg0: i32) -> (i32, i32) {
    %c0_i32 = arith.constant 0 : i32
    %c0_i32_0 = arith.constant 0 : i32
    return %arg0, %c0_i32 : i32, i32
  }
}

</mosaic_0001>

<bundles_post_ra>
// kernel: tpu_custom_call.1
= control target key start
LH: loop header
LB: loop body
LE: loop exit
PB: predicated region body
PF: predicated region fallthrough
CT: control target
= control target key end

     0   :  { %6 = vsyncpa [#allocation3], 0  ;;  %s876_s6 = smov [#allocation2]   ;;  %s1347_s0 = inlined_call_operand.hbm [shape: f32[8,2048], index: 0, kind: input, shape index: {}]   ;;  %s1348_s1 = inlined_call_operand.vmem [shape: f32[8,1], index: 1, kind: output, shape index: {}]  }
   0x1   :  { %s13_s7 = sshll.u32 %s876_s6, 4  ;;  %s14_s7 = int_to_ptr.vmem [resolvable:$true] %s13_s7 }
   0x2   :  { %s862_s8 = scalar_lea.vmem %s14_s7, 2048  ;;  %p867_p1 = scmp.lt.s32.totalorder %s14_s7, %s14_s7 }
   0x3   :  { %p863_p0 = scmp.ne.s32.totalorder %s14_s7, %s862_s8  ;;  %p868_p2 = scmp.lt.s32.totalorder %s862_s8, %s862_s8 }
   0x5   :  { %p869_p3 = por %p868_p2, %p867_p1 }
   0x7   :  { %p870_p4 = pnand %p869_p3, %p863_p0 }
   0x9   :  { %873 = shalt.err (!%p870_p4)
}
   0xa   :  { %16 = dma.hbm_to_vmem [thread:$0]  %s1347_s0, 2048, %s14_s7, [#allocation3]  }
   0xb   :  { %874 = dma.done.wait [#allocation3], 2048  }
   0xc   :  { %875 = vsyncadd [#allocation3], 4294965248  ;;  %v893_v0 = vld [vmem:[#allocation2 + $0x78] sm:$0xff]  ;;  %v895_v1 = vld [vmem:[#allocation2] sm:$0xff]  ;;  %s877_s11 = smov 1   ;;  %s878_s12 = smov 16   ;;  %v20_v16 = vlaneseq }
   0xd   :  { %1359 = vst [vmem:[#allocation5_spill] sm:$0xff] %v893_v0  ;;  %566 = vrot.lane.b32.xlu1 %v893_v0, %s877_s11  ;;  %536 = vrot.lane.b32.xlu0 %v895_v1, %s877_s11  ;;  %v901_v2 = vld [vmem:[#allocation2 + $0x8] sm:$0xff]  ;;  %v911_v3 = vld [vmem:[#allocation2 + $0x10] sm:$0xff]  ;;  %v917_v4 = vld [vmem:[#allocation2 + $0x18] sm:$0xff]  ;;  %v1351_v27 = vmov 0.0  }
   0xe   :  { %v923_v5 = vld [vmem:[#allocation2 + $0x20] sm:$0xff]  ;;  %v929_v6 = vld [vmem:[#allocation2 + $0x28] sm:$0xff]  ;;  %v935_v7 = vld [vmem:[#allocation2 + $0x30] sm:$0xff]  ;;  %v989_v17 = vand.u32 127, %v20_v16  ;;  %v748_v29 = vsub.f32 %v911_v3, %v895_v1  ;;  %v747_v32 = vsub.f32 %v901_v2, %v893_v0  ;;  %v749_v33 = vsub.f32 %v917_v4, %v901_v2 }
   0xf   :  { %v941_v8 = vld [vmem:[#allocation2 + $0x38] sm:$0xff]  ;;  %v947_v9 = vld [vmem:[#allocation2 + $0x40] sm:$0xff]  ;;  %v953_v10 = vld [vmem:[#allocation2 + $0x48] sm:$0xff]  ;;  %v750_v39 = vsub.f32 %v923_v5, %v911_v3  ;;  %v751_v49 = vsub.f32 %v929_v6, %v917_v4  ;;  %v752_v63 = vsub.f32 %v935_v7, %v923_v5 }
  0x10   :  { %v959_v11 = vld [vmem:[#allocation2 + $0x50] sm:$0xff]  ;;  %v965_v12 = vld [vmem:[#allocation2 + $0x58] sm:$0xff]  ;;  %v971_v13 = vld [vmem:[#allocation2 + $0x60] sm:$0xff]  ;;  %v41_v18 = vand.u32 15, %v989_v17  ;;  %v22_v19 = vadd.s32 128, %v989_v17  ;;  %v265_v20 = vand.u32 255, %v989_v17 }
  0x11   :  { %633 = vrot.lane.b32.xlu1 %v895_v1, %s878_s12  ;;  %538 = vrot.lane.b32.xlu0 %v901_v2, %s877_s11  ;;  %1360 = vst [vmem:[#allocation6_spill] sm:$0xff] %v971_v13  ;;  %v977_v14 = vld [vmem:[#allocation2 + $0x68] sm:$0xff]  ;;  %v983_v15 = vld [vmem:[#allocation2 + $0x70] sm:$0xff]  ;;  %v23_v21 = vadd.s32 256, %v989_v17  ;;  %v24_v25 = vadd.s32 384, %v989_v17  ;;  %v25_v26 = vadd.s32 512, %v989_v17 }
  0x12   :  { %1361 = vst [vmem:[#allocation7_spill] sm:$0xff] %v983_v15  ;;  %vm229_vm0 = vcmp.ne.s32.totalorder %v41_v18, 0  ;;  %v48_v22 = vand.u32 15, %v22_v19  ;;  %vm453_vm1 = vcmp.ge.s32.totalorder %v265_v20, 16  ;;  %v26_v30 = vadd.s32 640, %v989_v17 }
  0x13   :  { %v279_v23 = vand.u32 255, %v23_v21  ;;  %v55_v24 = vand.u32 15, %v23_v21  ;;  %v998_v28 = vsel %vm229_vm0, 6.510417e-05, %v1351_v27  ;;  %v1004_v31 = vsel %vm453_vm1, 6.510417e-05, %v1351_v27 }
  0x14   :  { %vm230_vm2 = vcmp.ne.s32.totalorder %v48_v22, 0  ;;  %v746_v34 = vsub.f32 %v895_v1, %v983_v15  ;;  %v62_v36 = vand.u32 15, %v24_v25  ;;  %v293_v37 = vand.u32 255, %v25_v26 }
  0x15   :  { %663 = vrot.lane.b32.xlu1 %v893_v0, %s878_s12  ;;  %635 = vrot.lane.b32.xlu0 %v901_v2, %s878_s12  ;;  %vm455_vm3 = vcmp.ge.s32.totalorder %v279_v23, 16  ;;  %vm1012_vm4 = vcmp.ne.s32.totalorder %v55_v24, 0  ;;  %v69_v38 = vand.u32 15, %v25_v26  ;;  %v27_v40 = vadd.s32 768, %v989_v17 }
  0x16   :  { %v1020_v41 = vsel %vm230_vm2, 6.510417e-05, %v1351_v27  ;;  %v764_v42 = vand.u32 2147483647, %v748_v29  ;;  %v76_v43 = vand.u32 15, %v26_v30  ;;  %vm232_vm5 = vcmp.ne.s32.totalorder %v62_v36, 0 }
  0x17   :  { %v763_v46 = vand.u32 2147483647, %v747_v32  ;;  %v1027_v47 = vsel %vm455_vm3, 6.510417e-05, %v1351_v27  ;;  %v765_v48 = vand.u32 2147483647, %v749_v33  ;;  %v753_v23 = vsub.f32 %v941_v8, %v929_v6 }
  0x18   :  { %v762_v50 = vand.u32 2147483647, %v746_v34  ;;  %v1034_v51 = vsel %vm1012_vm4, 6.510417e-05, %v1351_v27  ;;  %v28_v52 = vadd.s32 896, %v989_v17  ;;  %vm457_vm6 = vcmp.ge.s32.totalorder %v293_v37, 16 }
  0x19   :  { %637 = vrot.lane.b32.xlu1 %v911_v3, %s878_s12  ;;  %540 = vrot.lane.b32.xlu0 %v911_v3, %s877_s11  ;;  %vm233_vm7 = vcmp.ne.s32.totalorder %v69_v38, 0  ;;  %v766_v53 = vand.u32 2147483647, %v750_v39  ;;  %v307_v54 = vand.u32 255, %v27_v40  ;;  %v1037_v55 = vmul.f32 6.975447e-05, %v764_v42 }
  0x1a   :  { %vm234_vm8 = vcmp.ne.s32.totalorder %v76_v43, 0  ;;  %v83_v56 = vand.u32 15, %v27_v40  ;;  %v29_v57 = vadd.s32 1024, %v989_v17  ;;  %v1043_v60 = vsel %vm232_vm5, 6.510417e-05, %v1351_v27 }
  0x1b   :  { %v1045_v61 = vmul.f32 6.975447e-05, %v765_v48  ;;  %v767_v62 = vand.u32 2147483647, %v751_v49  ;;  %vm568_vm9 = vcmp.lt.s32.totalorder %v989_v17, 1  ;;  %v90_v19 = vand.u32 15, %v28_v52 }
  0x1c   :  { %v1051_v16 = vsel %vm457_vm6, 6.510417e-05, %v1351_v27  ;;  %v1054_v18 = vsel %vm233_vm7, 6.510417e-05, %v1351_v27  ;;  %v30_v20 = vadd.s32 1152, %v989_v17  ;;  %vm459_vm10 = vcmp.ge.s32.totalorder %v307_v54, 16 }
  0x1d   :  { %639 = vrot.lane.b32.xlu1 %v917_v4, %s878_s12  ;;  %542 = vrot.lane.b32.xlu0 %v917_v4, %s877_s11  ;;  %v1057_v21 = vmul.f32 6.975447e-05, %v766_v53  ;;  %v1060_v22 = vsel %vm234_vm8, 6.510417e-05, %v1351_v27  ;;  %vm235_vm11 = vcmp.ne.s32.totalorder %v83_v56, 0  ;;  %v321_v24 = vand.u32 255, %v29_v57 }
  0x1e   :  { %v754_v25 = vsub.f32 %v947_v9, %v935_v7  ;;  %v31_v26 = vadd.s32 1280, %v989_v17  ;;  %vm665_vm12 = vcmp.lt.s32.totalorder %v989_v17, 16  ;;  %v1070_v32 = vmul.f32 6.975447e-05, %v767_v62 }
  0x1f   :  { %v768_v33 = vand.u32 2147483647, %v752_v63  ;;  %v97_v34 = vand.u32 15, %v29_v57  ;;  %v1073_v35 = vsel %vm459_vm10, 6.510417e-05, %v1351_v27  ;;  %vm236_vm13 = vcmp.ne.s32.totalorder %v90_v19, 0 }
  0x20   :  { %v104_v36 = vand.u32 15, %v30_v20  ;;  %v755_v37 = vsub.f32 %v953_v10, %v941_v8  ;;  %v1077_v38 = vmul.f32 0.0, %v763_v46  ;;  %v1080_v39 = vsel %vm235_vm11, 6.510417e-05, %v1351_v27 }
  0x21   :  { %641 = vrot.lane.b32.xlu1 %v923_v5, %s878_s12  ;;  %544 = vrot.lane.b32.xlu0 %v923_v5, %s877_s11  ;;  %v769_v40 = vand.u32 2147483647, %v753_v23  ;;  %v32_v42 = vadd.s32 1408, %v989_v17  ;;  %vm1083_vm14 = vcmp.ge.s32.totalorder %v321_v24, 16  ;;  %v770_v48 = vand.u32 2147483647, %v754_v25 }
  0x22   :  { %v335_v49 = vand.u32 255, %v31_v26  ;;  %v111_v52 = vand.u32 15, %v31_v26  ;;  %v1087_v53 = vmul.f32 0.0, %v762_v50  ;;  %v1089_v57 = vmul.f32 6.975447e-05, %v768_v33 }
  0x23   :  { %v1092_v46 = vsel %vm236_vm13, 6.510417e-05, %v1351_v27  ;;  %vm237_vm15 = vcmp.ne.s32.totalorder %v97_v34, 0  ;;  %vm1094_vm0 = vcmp.ne.s32.totalorder %v104_v36, 0  ;;  %v771_v63 = vand.u32 2147483647, %v755_v37 }
  0x24   :  { %v756_v19 = vsub.f32 %v959_v11, %v947_v9  ;;  %v33_v20 = vadd.s32 1536, %v989_v17  ;;  %v1104_v23 = vmul.f32 6.975447e-05, %v769_v40  ;;  %v1109_v24 = vsel %vm1083_vm14, 6.510417e-05, %v1351_v27 }
  0x25   :  { %643 = vrot.lane.b32.xlu1 %v929_v6, %s878_s12  ;;  %546 = vrot.lane.b32.xlu0 %v929_v6, %s877_s11  ;;  %v118_v25 = vand.u32 15, %v32_v42  ;;  %v1112_v26 = vsel %vm237_vm15, 6.510417e-05, %v1351_v27  ;;  %v1114_v33 = vmul.f32 6.975447e-05, %v770_v48  ;;  %vm463_vm1 = vcmp.ge.s32.totalorder %v335_v49, 16 }
  0x26   :  { %1370 = vst [vmem:[#allocation10_spill] sm:$0xff] %v1104_v23  ;;  %vm239_vm2 = vcmp.ne.s32.totalorder %v111_v52, 0  ;;  %v1125_v42 = vsel %vm1094_vm0, 6.510417e-05, %v1351_v27  ;;  %v757_v43 = vsub.f32 %v965_v12, %v953_v10  ;;  %v1130_v49 = vmul.f32 6.975447e-05, %v771_v63 }
  0x27   :  { %1371 = vst [vmem:[#allocation11_spill] sm:$0xff] %v1114_v33  ;;  %v772_v52 = vand.u32 2147483647, %v756_v19  ;;  %v1140_v62 = vsel %vm239_vm2, 6.510417e-05, %v1351_v27  ;;  %vm1142_vm3 = vcmp.ne.s32.totalorder %v118_v25, 0 }
  0x28   :  { %1372 = vst [vmem:[#allocation12_spill] sm:$0xff] %v1130_v49  ;;  %1373 = vst [vmem:[#allocation13_spill] sm:$0xff] %v1140_v62  ;;  %v773_v23 = vand.u32 2147483647, %v757_v43  ;;  %v1377_v62 = vmov 0.0  }
  0x29   :  { %645 = vrot.lane.b32.xlu1 %v935_v7, %s878_s12  ;;  %548 = vrot.lane.b32.xlu0 %v935_v7, %s877_s11 }
  0x2d   :  { %647 = vrot.lane.b32.xlu1 %v941_v8, %s878_s12  ;;  %550 = vrot.lane.b32.xlu0 %v941_v8, %s877_s11 }
  0x31   :  { %649 = vrot.lane.b32.xlu1 %v947_v9, %s878_s12  ;;  %552 = vrot.lane.b32.xlu0 %v947_v9, %s877_s11 }
  0x35   :  { %651 = vrot.lane.b32.xlu1 %v953_v10, %s878_s12  ;;  %554 = vrot.lane.b32.xlu0 %v953_v10, %s877_s11 }
  0x39   :  { %653 = vrot.lane.b32.xlu1 %v959_v11, %s878_s12  ;;  %556 = vrot.lane.b32.xlu0 %v959_v11, %s877_s11 }
  0x3d   :  { %655 = vrot.lane.b32.xlu1 %v965_v12, %s878_s12  ;;  %558 = vrot.lane.b32.xlu0 %v965_v12, %s877_s11 }
  0x41   :  { %657 = vrot.lane.b32.xlu1 %v971_v13, %s878_s12  ;;  %560 = vrot.lane.b32.xlu0 %v971_v13, %s877_s11 }
  0x45   :  { %659 = vrot.lane.b32.xlu1 %v977_v14, %s878_s12  ;;  %562 = vrot.lane.b32.xlu0 %v977_v14, %s877_s11 }
  0x49   :  { %661 = vrot.lane.b32.xlu1 %v983_v15, %s878_s12  ;;  %564 = vrot.lane.b32.xlu0 %v983_v15, %s877_s11  ;;  %v125_v15 = vand.u32 15, %v33_v20 }
  0x4b   :  { %vm1176_vm5 = vcmp.ne.s32.totalorder %v125_v15, 0 }
  0x7f   :  { %v1022_v44 = vpop.permute.xlu1 %566  ;;  %v1024_v45 = vpop.permute.xlu0 %536 }
  0x80   :  { %1364 = vst [vmem:[#allocation8_spill] sm:$0xff] %v1022_v44  ;;  %v584_v34 = vsel %vm568_vm9, %v1022_v44, %v1024_v45  ;;  %v1137_v44 = vsel %vm463_vm1, 6.510417e-05, %v1351_v27 }
  0x81   :  { %v585_v63 = vsub.f32 %v895_v1, %v584_v34 }
  0x83   :  { %v634_v58 = vpop.permute.xlu1 %633  ;;  %v1040_v59 = vpop.permute.xlu0 %538  ;;  %v601_v43 = vand.u32 2147483647, %v585_v63 }
  0x87   :  { %v1068_v29 = vpop.permute.xlu1 %663  ;;  %v636_v30 = vpop.permute.xlu0 %635 }
  0x88   :  { %1365 = vst [vmem:[#allocation9_spill] sm:$0xff] %v1068_v29  ;;  %v681_v50 = vsel %vm665_vm12, %v1068_v29, %v634_v58  ;;  %v680_v36 = vsel %vm665_vm12, %v634_v58, %v636_v30  ;;  %v349_v29 = vand.u32 255, %v33_v20  ;;  %v583_v58 = vsel %vm568_vm9, %v1024_v45, %v1040_v59 }
  0x89   :  { %v682_v48 = vsub.f32 %v895_v1, %v681_v50  ;;  %v683_v19 = vsub.f32 %v901_v2, %v680_v36  ;;  %v586_v1 = vsub.f32 %v901_v2, %v583_v58  ;;  %v1158_v36 = vmul.f32 6.975447e-05, %v772_v52 }
  0x8a   :  { %vm465_vm4 = vcmp.ge.s32.totalorder %v349_v29, 16  ;;  %v1171_v58 = vmul.f32 6.975447e-05, %v773_v23 }
  0x8b   :  { %v638_v54 = vpop.permute.xlu1 %637  ;;  %v541_v56 = vpop.permute.xlu0 %540  ;;  %v698_v34 = vand.u32 2147483647, %v682_v48  ;;  %1376 = vst [vmem:[#allocation14_spill] sm:$0xff] %v1158_v36  ;;  %v699_v20 = vand.u32 2147483647, %v683_v19 }
  0x8c   :  { %v679_v50 = vsel %vm665_vm12, %v636_v30, %v638_v54  ;;  %v582_v45 = vsel %vm568_vm9, %v1040_v59, %v541_v56  ;;  %1379 = vst [vmem:[#allocation16_spill] sm:$0xff] %v1171_v58  ;;  %v617_v58 = vmul.f32 %v601_v43, %v998_v28 }
  0x8d   :  { %v684_v30 = vsub.f32 %v911_v3, %v679_v50  ;;  %v587_v59 = vsub.f32 %v911_v3, %v582_v45  ;;  %v1174_v3 = vsel %vm465_vm4, 6.510417e-05, %v1377_v62  ;;  %v34_v50 = vadd.s32 1664, %v989_v17 }
  0x8e   :  { %1380 = vst [vmem:[#allocation17_spill] sm:$0xff] %v1174_v3  ;;  %v602_v45 = vand.u32 2147483647, %v586_v1  ;;  %v714_v63 = vmul.f32 %v698_v34, %v1004_v31  ;;  %v715_v15 = vmul.f32 6.510417e-05, %v699_v20 }
  0x8f   :  { %v640_v37 = vpop.permute.xlu1 %639  ;;  %v543_v40 = vpop.permute.xlu0 %542  ;;  %v700_v23 = vand.u32 2147483647, %v684_v30  ;;  %v603_v19 = vand.u32 2147483647, %v587_v59 }
  0x90   :  { %v678_v49 = vsel %vm665_vm12, %v638_v54, %v640_v37  ;;  %v581_v25 = vsel %vm568_vm9, %v541_v56, %v543_v40  ;;  %v1165_v54 = vsel %vm1142_vm3, 6.510417e-05, %v1377_v62  ;;  %v758_v56 = vsub.f32 %v971_v13, %v959_v11 }
  0x91   :  { %1378 = vst [vmem:[#allocation15_spill] sm:$0xff] %v1165_v54  ;;  %v685_v2 = vsub.f32 %v917_v4, %v678_v49  ;;  %v588_v48 = vsub.f32 %v917_v4, %v581_v25  ;;  %v618_v34 = vmul.f32 %v602_v45, %v1020_v41  ;;  %v730_v30 = vadd.f32 %v714_v63, %v617_v58 }
  0x92   :  { %v774_v25 = vand.u32 2147483647, %v758_v56  ;;  %v716_v56 = vmul.f32 %v700_v23, %v1027_v47 }
  0x93   :  { %v642_v27 = vpop.permute.xlu1 %641  ;;  %v545_v0 = vpop.permute.xlu0 %544  ;;  %v701_v36 = vand.u32 2147483647, %v685_v2  ;;  %v604_v3 = vand.u32 2147483647, %v588_v48  ;;  %v731_v2 = vadd.f32 %v715_v15, %v618_v34 }
  0x94   :  { %v677_v49 = vsel %vm665_vm12, %v640_v37, %v642_v27  ;;  %v580_v4 = vsel %vm568_vm9, %v543_v40, %v545_v0  ;;  %v1192_v37 = vsel %vm1176_vm5, 6.510417e-05, %v1377_v62  ;;  %v132_v40 = vand.u32 15, %v34_v50 }
  0x95   :  { %v686_v54 = vsub.f32 %v923_v5, %v677_v49  ;;  %v589_v1 = vsub.f32 %v923_v5, %v580_v4  ;;  %v619_v5 = vmul.f32 %v603_v19, %v1034_v51  ;;  %v717_v48 = vmul.f32 6.510417e-05, %v701_v36 }
  0x96   :  { %v620_v41 = vmul.f32 %v604_v3, %v1043_v60  ;;  %v1206_v58 = vmul.f32 6.975447e-05, %v774_v25  ;;  %v1216_v36 = vadd.s32 1920, %v989_v17  ;;  %v794_v60 = vadd.f32 %v1087_v53, %v730_v30  ;;  %v1397_v3 = vld [vmem:[#allocation11_spill] sm:$0xff] }
  0x97   :  { %v644_v52 = vpop.permute.xlu1 %643  ;;  %v547_v29 = vpop.permute.xlu0 %546  ;;  %v605_v33 = vand.u32 2147483647, %v589_v1  ;;  %vm1219_vm6 = vcmp.ne.s32.totalorder %v132_v40, 0  ;;  %v795_v63 = vadd.f32 %v1077_v38, %v731_v2 }
  0x98   :  { %v676_v28 = vsel %vm665_vm12, %v642_v27, %v644_v52  ;;  %v579_v59 = vsel %vm568_vm9, %v545_v0, %v547_v29  ;;  %v702_v27 = vand.u32 2147483647, %v686_v54  ;;  %v732_v54 = vadd.f32 %v716_v56, %v619_v5 }
  0x99   :  { %v687_v0 = vsub.f32 %v929_v6, %v676_v28  ;;  %v590_v47 = vsub.f32 %v929_v6, %v579_v59  ;;  %v759_v6 = vsub.f32 %v977_v14, %v965_v12  ;;  %v733_v49 = vadd.f32 %v717_v48, %v620_v41 }
  0x9a   :  { %v718_v23 = vmul.f32 %v702_v27, %v1051_v16  ;;  %v621_v53 = vmul.f32 %v605_v33, %v1054_v18  ;;  %v1242_v18 = vsel %vm1219_vm6, 6.510417e-05, %v1377_v62  ;;  %v826_v28 = vadd.f32 %v795_v63, %v794_v60 }
  0x9b   :  { %v646_v13 = vpop.permute.xlu1 %645  ;;  %v549_v31 = vpop.permute.xlu0 %548  ;;  %v703_v19 = vand.u32 2147483647, %v687_v0  ;;  %v606_v25 = vand.u32 2147483647, %v590_v47  ;;  %v775_v63 = vand.u32 2147483647, %v759_v6 }
  0x9c   :  { %v675_v43 = vsel %vm665_vm12, %v644_v52, %v646_v13  ;;  %v578_v20 = vsel %vm568_vm9, %v547_v29, %v549_v31  ;;  %v1213_v29 = vadd.s32 1792, %v989_v17 }
  0x9d   :  { %v688_v45 = vsub.f32 %v935_v7, %v675_v43  ;;  %v591_v52 = vsub.f32 %v935_v7, %v578_v20  ;;  %v797_v43 = vadd.f32 %v1045_v61, %v733_v49  ;;  %v734_v20 = vadd.f32 %v718_v23, %v621_v53 }
  0x9e   :  { %v363_v5 = vand.u32 255, %v1213_v29  ;;  %v622_v2 = vmul.f32 %v606_v25, %v1060_v22  ;;  %v146_v61 = vand.u32 15, %v1216_v36 }
  0x9f   :  { %v648_v50 = vpop.permute.xlu1 %647  ;;  %v551_v51 = vpop.permute.xlu0 %550  ;;  %v704_v40 = vand.u32 2147483647, %v688_v45  ;;  %v607_v34 = vand.u32 2147483647, %v591_v52 }
  0xa0   :  { %v674_v7 = vsel %vm665_vm12, %v646_v13, %v648_v50  ;;  %v577_v4 = vsel %vm568_vm9, %v549_v31, %v551_v51  ;;  %v796_v13 = vadd.f32 %v1037_v55, %v732_v54  ;;  %v719_v55 = vmul.f32 6.510417e-05, %v703_v19 }
  0xa1   :  { %v689_v31 = vsub.f32 %v941_v8, %v674_v7  ;;  %v592_v16 = vsub.f32 %v941_v8, %v577_v4  ;;  %v720_v41 = vmul.f32 %v704_v40, %v1073_v35  ;;  %v623_v27 = vmul.f32 %v607_v34, %v1080_v39 }
  0xa2   :  { %v827_v0 = vadd.f32 %v826_v28, %v796_v13  ;;  %v798_v39 = vadd.f32 %v1057_v21, %v734_v20  ;;  %vm1259_vm7 = vcmp.ge.s32.totalorder %v363_v5, 16  ;;  %v735_v49 = vadd.f32 %v719_v55, %v622_v2  ;;  %v1389_v55 = vld [vmem:[#allocation13_spill] sm:$0xff] }
  0xa3   :  { %v650_v15 = vpop.permute.xlu1 %649  ;;  %v553_v1 = vpop.permute.xlu0 %552  ;;  %v705_v47 = vand.u32 2147483647, %v689_v31  ;;  %v736_v7 = vadd.f32 %v720_v41, %v623_v27  ;;  %vm1273_vm8 = vcmp.ne.s32.totalorder %v146_v61, 0 }
  0xa4   :  { %v673_v38 = vsel %vm665_vm12, %v648_v50, %v650_v15  ;;  %v576_v30 = vsel %vm568_vm9, %v551_v51, %v553_v1  ;;  %v608_v50 = vand.u32 2147483647, %v592_v16  ;;  %v828_v35 = vadd.f32 %v827_v0, %v797_v43  ;;  %v1392_v0 = vld [vmem:[#allocation10_spill] sm:$0xff] }
  0xa5   :  { %v690_v59 = vsub.f32 %v947_v9, %v673_v38  ;;  %v593_v56 = vsub.f32 %v947_v9, %v576_v30  ;;  %v721_v23 = vmul.f32 6.510417e-05, %v705_v47  ;;  %v139_v30 = vand.u32 15, %v1213_v29 }
  0xa6   :  { %v799_v31 = vadd.f32 %v1070_v32, %v735_v49 }
  0xa7   :  { %v652_v48 = vpop.permute.xlu1 %651  ;;  %v555_v8 = vpop.permute.xlu0 %554  ;;  %v706_v51 = vand.u32 2147483647, %v690_v59  ;;  %v609_v45 = vand.u32 2147483647, %v593_v56  ;;  %v800_v59 = vadd.f32 %v1089_v57, %v736_v7  ;;  %v260_v57 = vsel %vm1273_vm8, 6.510417e-05, %v1377_v62 }
  0xa8   :  { %v672_v33 = vsel %vm665_vm12, %v650_v15, %v652_v48  ;;  %v575_v9 = vsel %vm568_vm9, %v553_v1, %v555_v8  ;;  %vm1304_vm10 = vcmp.ne.s32.totalorder %v139_v30, 0 }
  0xa9   :  { %v691_v22 = vsub.f32 %v953_v10, %v672_v33  ;;  %v594_v52 = vsub.f32 %v953_v10, %v575_v9  ;;  %v624_v10 = vmul.f32 %v608_v50, %v1092_v46  ;;  %v722_v19 = vmul.f32 %v706_v51, %v1109_v24  ;;  %v1390_v33 = vld [vmem:[#allocation6_spill] sm:$0xff]  ;;  %v1395_v51 = vld [vmem:[#allocation5_spill] sm:$0xff] }
  0xaa   :  { %v625_v25 = vmul.f32 %v609_v45, %v1112_v26  ;;  %v829_v46 = vadd.f32 %v828_v35, %v798_v39  ;;  %v1284_v26 = vsel %vm1259_vm7, 6.510417e-05, %v1377_v62  ;;  %v761_v45 = vsub.f32 %v1395_v51, %v977_v14  ;;  %v1396_v35 = vld [vmem:[#allocation15_spill] sm:$0xff] }
  0xab   :  { %v654_v60 = vpop.permute.xlu1 %653  ;;  %v557_v54 = vpop.permute.xlu0 %556  ;;  %v707_v6 = vand.u32 2147483647, %v691_v22  ;;  %v610_v15 = vand.u32 2147483647, %v594_v52  ;;  %v737_v16 = vadd.f32 %v721_v23, %v624_v10 }
  0xac   :  { %v671_v36 = vsel %vm665_vm12, %v652_v48, %v654_v60  ;;  %v574_v4 = vsel %vm568_vm9, %v555_v8, %v557_v54  ;;  %v738_v56 = vadd.f32 %v722_v19, %v625_v25  ;;  %v791_v19 = vmul.f32 6.975447e-05, %v775_v63 }
  0xad   :  { %v692_v21 = vsub.f32 %v959_v11, %v671_v36  ;;  %v595_v53 = vsub.f32 %v959_v11, %v574_v4  ;;  %v723_v5 = vmul.f32 6.510417e-05, %v707_v6  ;;  %v626_v43 = vmul.f32 %v610_v15, %v1125_v42  ;;  %v1391_v42 = vld [vmem:[#allocation7_spill] sm:$0xff]  ;;  %v1398_v6 = vld [vmem:[#allocation17_spill] sm:$0xff] }
  0xae   :  { %v760_v9 = vsub.f32 %v1391_v42, %v1390_v33  ;;  %v801_v47 = vadd.f32 %v1392_v0, %v737_v16  ;;  %v802_v49 = vadd.f32 %v1397_v3, %v738_v56  ;;  %v1401_v56 = vld [vmem:[#allocation9_spill] sm:$0xff] }
  0xaf   :  { %v708_v1 = vand.u32 2147483647, %v692_v21  ;;  %v611_v40 = vand.u32 2147483647, %v595_v53  ;;  %v656_v34 = vpop.permute.xlu1 %655  ;;  %v559_v38 = vpop.permute.xlu0 %558  ;;  %v739_v22 = vadd.f32 %v723_v5, %v626_v43  ;;  %v1402_v43 = vld [vmem:[#allocation8_spill] sm:$0xff] }
  0xb0   :  { %v670_v11 = vsel %vm665_vm12, %v654_v60, %v656_v34  ;;  %v573_v24 = vsel %vm568_vm9, %v557_v54, %v559_v38 }
  0xb1   :  { %v693_v29 = vsub.f32 %v965_v12, %v670_v11  ;;  %v596_v28 = vsub.f32 %v965_v12, %v573_v24  ;;  %v724_v20 = vmul.f32 %v708_v1, %v1137_v44  ;;  %v627_v2 = vmul.f32 %v611_v40, %v1389_v55  ;;  %v1400_v24 = vld [vmem:[#allocation14_spill] sm:$0xff] }
  0xb2   :  { %v830_v44 = vadd.f32 %v829_v46, %v799_v31  ;;  %v776_v46 = vand.u32 2147483647, %v760_v9 }
  0xb3   :  { %v709_v48 = vand.u32 2147483647, %v693_v29  ;;  %v612_v8 = vand.u32 2147483647, %v596_v28  ;;  %v658_v41 = vpop.permute.xlu1 %657  ;;  %v561_v27 = vpop.permute.xlu0 %560  ;;  %v740_v7 = vadd.f32 %v724_v20, %v627_v2 }
  0xb4   :  { %v669_v32 = vsel %vm665_vm12, %v656_v34, %v658_v41  ;;  %v572_v12 = vsel %vm568_vm9, %v559_v38, %v561_v27  ;;  %v831_v54 = vadd.f32 %v830_v44, %v800_v59  ;;  %v1399_v34 = vld [vmem:[#allocation12_spill] sm:$0xff] }
  0xb5   :  { %v694_v50 = vsub.f32 %v1390_v33, %v669_v32  ;;  %v725_v52 = vmul.f32 6.510417e-05, %v709_v48  ;;  %v628_v39 = vmul.f32 %v612_v8, %v1396_v35  ;;  %v597_v60 = vsub.f32 %v1390_v33, %v572_v12 }
  0xb6   :  { %v832_v25 = vadd.f32 %v831_v54, %v801_v47  ;;  %v803_v38 = vadd.f32 %v1399_v34, %v739_v22  ;;  %v804_v31 = vadd.f32 %v1400_v24, %v740_v7  ;;  %v777_v22 = vand.u32 2147483647, %v761_v45 }
  0xb7   :  { %v710_v36 = vand.u32 2147483647, %v694_v50  ;;  %v660_v4 = vpop.permute.xlu1 %659  ;;  %v563_v23 = vpop.permute.xlu0 %562  ;;  %v613_v10 = vand.u32 2147483647, %v597_v60  ;;  %v741_v30 = vadd.f32 %v725_v52, %v628_v39  ;;  %v792_v54 = vmul.f32 6.975447e-05, %v776_v46 }
  0xb8   :  { %v668_v21 = vsel %vm665_vm12, %v658_v41, %v660_v4  ;;  %v571_v53 = vsel %vm568_vm9, %v561_v27, %v563_v23  ;;  %v833_v11 = vadd.f32 %v832_v25, %v802_v49  ;;  %v1403_v41 = vld [vmem:[#allocation16_spill] sm:$0xff] }
  0xb9   :  { %v726_v15 = vmul.f32 %v710_v36, %v1398_v6  ;;  %v695_v1 = vsub.f32 %v977_v14, %v668_v21  ;;  %v598_v40 = vsub.f32 %v977_v14, %v571_v53  ;;  %v629_v13 = vmul.f32 %v613_v10, %v1192_v37 }
  0xba   :  { %v834_v8 = vadd.f32 %v833_v11, %v803_v38  ;;  %v805_v27 = vadd.f32 %v1403_v41, %v741_v30  ;;  %v793_v36 = vmul.f32 6.975447e-05, %v777_v22 }
  0xbb   :  { %v711_v16 = vand.u32 2147483647, %v695_v1  ;;  %v614_v29 = vand.u32 2147483647, %v598_v40  ;;  %v662_v28 = vpop.permute.xlu1 %661  ;;  %v565_v63 = vpop.permute.xlu0 %564  ;;  %v742_v59 = vadd.f32 %v726_v15, %v629_v13 }
  0xbc   :  { %v666_v5 = vsel %vm665_vm12, %v662_v28, %v1401_v56  ;;  %v667_v14 = vsel %vm665_vm12, %v660_v4, %v662_v28  ;;  %v569_v37 = vsel %vm568_vm9, %v565_v63, %v1402_v43  ;;  %v570_v32 = vsel %vm568_vm9, %v563_v23, %v565_v63 }
  0xbd   :  { %v727_v20 = vmul.f32 6.510417e-05, %v711_v16  ;;  %v630_v55 = vmul.f32 %v614_v29, %v1242_v18  ;;  %v696_v2 = vsub.f32 %v1391_v42, %v667_v14  ;;  %v697_v48 = vsub.f32 %v1395_v51, %v666_v5 }
  0xbe   :  { %v600_v12 = vsub.f32 %v1395_v51, %v569_v37  ;;  %v599_v0 = vsub.f32 %v1391_v42, %v570_v32  ;;  %v835_v47 = vadd.f32 %v834_v8, %v804_v31  ;;  %v259_v18 = vsel %vm1304_vm10, 6.510417e-05, %v1377_v62 }
  0xbf   :  { %v743_v33 = vadd.f32 %v727_v20, %v630_v55  ;;  %v712_v9 = vand.u32 2147483647, %v696_v2  ;;  %v713_v44 = vand.u32 2147483647, %v697_v48  ;;  %v806_v52 = vadd.f32 %v1206_v58, %v742_v59 }
  0xc0   :  { %v616_v50 = vand.u32 2147483647, %v600_v12  ;;  %v615_v39 = vand.u32 2147483647, %v599_v0  ;;  %v836_v49 = vadd.f32 %v835_v47, %v805_v27  ;;  %vm843_vm9 = vcmask 7168  }
  0xc1   :  { %v728_v35 = vmul.f32 %v712_v9, %v1284_v26  ;;  %v729_v17 = vmul.f32 6.510417e-05, %v713_v44  ;;  %v807_v3 = vadd.f32 %v791_v19, %v743_v33 }
  0xc2   :  { %v632_v60 = vmul.f32 %v616_v50, %v260_v57  ;;  %v631_v51 = vmul.f32 %v615_v39, %v259_v18  ;;  %v837_v4 = vadd.f32 %v836_v49, %v806_v52 }
  0xc4   :  { %v744_v7 = vadd.f32 %v728_v35, %v631_v51  ;;  %v745_v42 = vadd.f32 %v729_v17, %v632_v60  ;;  %v838_v61 = vadd.f32 %v837_v4, %v807_v3 }
  0xc6   :  { %v808_v23 = vadd.f32 %v792_v54, %v744_v7  ;;  %v809_v62 = vadd.f32 %v793_v36, %v745_v42 }
  0xc8   :  { %v839_v10 = vadd.f32 %v838_v61, %v808_v23 }
  0xca   :  { %v840_v45 = vadd.f32 %v839_v10, %v809_v62 }
  0xcc   :  { %841 = vadd.xlane.f32.xlu0 %v840_v45 }
 0x155   :  { %v842_v58 = vpop.xlane.xlu0 %841 }
 0x156   :  { %844 = vst.msk [vmem:[%s1348_s1] sm:$0xff] %vm843_vm9, %v842_v58 }
 0x157   :  { %849 = vsyncpa [#allocation3], 1 }

</bundles_post_ra>
